<compile_context>
chip_gen: v7x
topology: tpu7x:2x2x1
jax: 0.10.0
libtpu: 0.0.40
codegen_flags: <defaults>
</compile_context>

<pallas_src>
import jax
import jax.numpy as jnp
from jax.experimental import pallas as pl
from jax.experimental.pallas import tpu as pltpu


def _round_up(n, m):
    return ((n + m - 1) // m) * m


def _cdiv(a, b):
    return (a + b - 1) // b


def _vmem_budget_and_limit():
    """Generation-aware scoped-VMEM limit and planning budget (bytes)."""
    cap = 64 * 1024 * 1024  # conservative default: v7x has 64 MiB per TensorCore
    try:
        info = pltpu.get_tpu_info()
        cap = int(getattr(info, "vmem_capacity_bytes", cap)) or cap
    except Exception:
        # Query can fail off-TPU / on older jax; the fallback is strictly more
        # conservative, so swallowing here cannot loosen any constraint.
        pass
    limit = int(cap * 0.8)                 # leave Mosaic headroom below physical
    budget = max(limit - (6 << 20), 16 << 20)
    return budget, limit


def _supports_single_buffering():
    """Detect pl.Buffered / pipeline_mode support without swallowing compile errors."""
    if not hasattr(pl, "Buffered"):
        return False
    try:
        pl.BlockSpec((8, 128), lambda i: (0, 0), pipeline_mode=pl.Buffered(1))
    except TypeError:
        return False
    return True


def _pick_tm(m_rows, H, Hp, act_bytes, mm_bytes, sub, budget, wbufs, tm_target=None):
    """Row tile: big enough to amortize per-step overhead, small enough for VMEM."""
    resident = wbufs * (2 * Hp * Hp * mm_bytes + 2 * Hp * 4)  # weights + f32 biases

    def tile_bytes(t):
        io = 4 * t * H * act_bytes                    # double-buffered in + out tiles
        pad = t * Hp * mm_bytes if Hp != H else 0     # in-kernel zero-extend scratch
        interm = 3 * t * Hp * 4                       # f32 matmul temporaries (heuristic)
        return io + pad + interm

    if resident + tile_bytes(sub) > budget:
        # TODO(synk): reduction-tiled path over Hp chunks for very large hidden dims.
        raise ValueError(
            f"hidden dim {H} (padded {Hp}) needs ~{resident / 2**20:.1f} MiB of "
            f"resident weights, exceeding the {budget / 2**20:.1f} MiB VMEM budget")

    if m_rows <= sub:
        return m_rows                                 # single tiny full-dim block

    if tm_target is None:
        # ~4 MiB of HBM activation traffic per grid step.
        tm_target = (4 << 20) // max(2 * H * act_bytes, 1)
    tm = int(min(max(int(tm_target), 512), 4096))
    tm = min(tm, _round_up(m_rows, sub))
    tm = max(sub, _round_up(tm, sub))
    while tm > sub and resident + tile_bytes(tm) > budget:
        tm = max(sub, _round_up(tm // 2, sub))

    grid = _cdiv(m_rows, tm)
    if grid == 1 and m_rows >= 2 * sub:
        grid = 2                                      # give both v7x TensorCores work
    if grid > 1 and grid % 2 == 1 and _cdiv(m_rows, grid + 1) >= sub:
        grid += 1                                     # even block count across 2 TCs
    tm = max(sub, _round_up(_cdiv(m_rows, grid), sub))
    if tm >= m_rows:
        tm = m_rows                                   # full-dim block is always legal
    return tm


def _make_kernel(H, Hp, mm_dtype):
    if Hp == H:
        def kernel(x_ref, w1t_ref, b1_ref, w2t_ref, b2_ref, o_ref):
            x = x_ref[...].astype(mm_dtype)
            h = jnp.dot(x, w1t_ref[...], preferred_element_type=jnp.float32)
            h = jnp.maximum(h + b1_ref[...], 0.0).astype(mm_dtype)   # bias+ReLU in f32
            y = jnp.dot(h, w2t_ref[...], preferred_element_type=jnp.float32)
            # Re-read x for the residual instead of holding it live across both matmuls.
            y = y + b2_ref[...] + x_ref[...].astype(jnp.float32)
            o_ref[...] = y.astype(o_ref.dtype)
        return kernel

    lane_floor = (H // 128) * 128   # aligned start of the padded lane group

    def kernel(x_ref, w1t_ref, b1_ref, w2t_ref, b2_ref, o_ref, xpad_ref):
        nrows = xpad_ref.shape[0]
        # Zero-extend the contraction dim in VMEM (required for correctness of
        # x @ w1t^pad).  Re-zero every step so this stays correct when the
        # parallel grid axis is split across TensorCores.
        xpad_ref[:, lane_floor:] = jnp.zeros((nrows, Hp - lane_floor), mm_dtype)
        xpad_ref[:, 0:H] = x_ref[...].astype(mm_dtype)
        xp = xpad_ref[...]
        h = jnp.dot(xp, w1t_ref[...], preferred_element_type=jnp.float32)
        h = jnp.maximum(h + b1_ref[...], 0.0).astype(mm_dtype)
        y = jnp.dot(h, w2t_ref[...], preferred_element_type=jnp.float32)
        y = y + b2_ref[...]
        o_ref[...] = (y[:, 0:H] + x_ref[...].astype(jnp.float32)).astype(o_ref.dtype)
    return kernel


def _build_ffn_call(M, H, Hp, tm, x_dtype, mm_dtype, single_buffer_weights,
                    vmem_limit, cost):
    kernel = _make_kernel(H, Hp, mm_dtype)
    w_kw = dict(pipeline_mode=pl.Buffered(1)) if single_buffer_weights else {}
    grid = _cdiv(M, tm)
    scratch = [pltpu.VMEM((tm, Hp), mm_dtype)] if Hp != H else []
    return pl.pallas_call(
        kernel,
        out_shape=jax.ShapeDtypeStruct((M, H), x_dtype),
        grid_spec=pltpu.PrefetchScalarGridSpec(
            num_scalar_prefetch=0,
            grid=(grid,),
            in_specs=[
                pl.BlockSpec((tm, H), lambda i: (i, 0)),             # activations
                pl.BlockSpec((Hp, Hp), lambda i: (0, 0), **w_kw),    # w1^T (resident)
                pl.BlockSpec((1, Hp), lambda i: (0, 0), **w_kw),     # b1
                pl.BlockSpec((Hp, Hp), lambda i: (0, 0), **w_kw),    # w2^T (resident)
                pl.BlockSpec((1, Hp), lambda i: (0, 0), **w_kw),     # b2
            ],
            out_specs=pl.BlockSpec((tm, H), lambda i: (i, 0)),
            scratch_shapes=scratch,
        ),
        compiler_params=pltpu.CompilerParams(
            dimension_semantics=("parallel",),
            vmem_limit_bytes=vmem_limit,
        ),
        cost_estimate=cost,
    )


def prepare_ffn_weights(w1, b1, w2, b2, *, mm_dtype, Hp):
    """Transpose / zero-pad Conv1d(k=1) params for the kernel.

    Hoist this out of the per-step path (or let it constant-fold under jit)
    when the weights are static across calls.
    """
    H = w1.shape[0]
    w1m = jnp.squeeze(w1, -1).T.astype(mm_dtype)   # (in, out)
    w2m = jnp.squeeze(w2, -1).T.astype(mm_dtype)
    if Hp == H:
        return (w1m, b1.astype(jnp.float32).reshape(1, H),
                w2m, b2.astype(jnp.float32).reshape(1, H))
    w1t = jnp.zeros((Hp, Hp), mm_dtype).at[:H, :H].set(w1m)
    w2t = jnp.zeros((Hp, Hp), mm_dtype).at[:H, :H].set(w2m)
    b1r = jnp.zeros((1, Hp), jnp.float32).at[:, :H].set(b1.astype(jnp.float32))
    b2r = jnp.zeros((1, Hp), jnp.float32).at[:, :H].set(b2.astype(jnp.float32))
    return w1t, b1r, w2t, b2r


def pointwise_feedforward(x, w1, b1, w2, b2, *, tm=None, use_bf16_matmul=False):
    """Eval-mode PointWiseFeedForward.

    x: (B, L, H).  w1, w2: Conv1d weights of shape (H, H, 1).  b1, b2: (H,).
    use_bf16_matmul: opt-in bf16 MXU operands for f32 inputs (f32 accumulation;
    looser numerics, biggest win on v5e where HBM/MXU f32 throughput is low).
    """
    B, L, H = x.shape
    M = B * L
    Hp = _round_up(H, 128)
    x_dtype = x.dtype
    if x_dtype == jnp.bfloat16 or use_bf16_matmul:
        mm_dtype = jnp.bfloat16
    else:
        mm_dtype = x_dtype

    act_bytes = jnp.dtype(x_dtype).itemsize
    mm_bytes = jnp.dtype(mm_dtype).itemsize
    sub = max(8, 32 // act_bytes)          # packed sublane multiple (8/16/32)

    single_buf = _supports_single_buffering()
    wbufs = 1 if single_buf else 2
    budget, vmem_limit = _vmem_budget_and_limit()

    tm = _pick_tm(M, H, Hp, act_bytes, mm_bytes, sub, budget, wbufs, tm_target=tm)

    w1t, b1r, w2t, b2r = prepare_ffn_weights(w1, b1, w2, b2, mm_dtype=mm_dtype, Hp=Hp)
    x2d = x.reshape(M, H)                  # leading-dim merge only: no copy, no pad

    cost = pl.CostEstimate(
        flops=4 * M * Hp * Hp,
        transcendentals=0,
        bytes_accessed=2 * M * H * act_bytes + 2 * Hp * Hp * mm_bytes + 2 * Hp * 4,
    )

    call = _build_ffn_call(M, H, Hp, tm, x_dtype, mm_dtype,
                           single_buffer_weights=single_buf,
                           vmem_limit=vmem_limit, cost=cost)
    out2d = call(x2d, w1t, b1r, w2t, b2r)
    return out2d.reshape(B, L, H)


def _reference(x, w1, b1, w2, b2):
    # Pure-JAX reference of the eval-mode PyTorch forward.
    w1m = jnp.squeeze(w1, -1)   # (H_out, H_in)
    w2m = jnp.squeeze(w2, -1)
    h = jnp.maximum(jnp.einsum("blh,oh->blo", x, w1m) + b1, 0.0)
    y = jnp.einsum("blh,oh->blo", h, w2m) + b2
    return y + x


if __name__ == "__main__":
    B, L, H = 2, 8, 32
    key = jax.random.PRNGKey(0)
    kx, k1, k2, k3, k4 = jax.random.split(key, 5)

    x = jax.random.normal(kx, (B, L, H), dtype=jnp.float32)
    # Conv1d(H, H, kernel_size=1) parameter shapes: weight (H, H, 1), bias (H,)
    bound = 1.0 / (H ** 0.5)
    w1 = jax.random.uniform(k1, (H, H, 1), minval=-bound, maxval=bound, dtype=jnp.float32)
    b1 = jax.random.uniform(k2, (H,), minval=-bound, maxval=bound, dtype=jnp.float32)
    w2 = jax.random.uniform(k3, (H, H, 1), minval=-bound, maxval=bound, dtype=jnp.float32)
    b2 = jax.random.uniform(k4, (H,), minval=-bound, maxval=bound, dtype=jnp.float32)

    out = pointwise_feedforward(x, w1, b1, w2, b2)
    out = jax.block_until_ready(out)

    ref = _reference(x, w1, b1, w2, b2)
    assert out.shape == (B, L, H)
    assert jnp.allclose(out, ref, atol=1e-5, rtol=1e-5), "mismatch vs reference"

    print("KERNEL_OK")
</pallas_src>

<mosaic_0001>
module attributes {stable_mosaic.version = 11 : i64} {
  func.func @kernel(%arg0: i32, %arg1: memref<8x32xf32, #tpu.memory_space<vmem>>, %arg2: memref<128x128xf32, #tpu.memory_space<vmem>>, %arg3: memref<1x128xf32, #tpu.memory_space<vmem>>, %arg4: memref<128x128xf32, #tpu.memory_space<vmem>>, %arg5: memref<1x128xf32, #tpu.memory_space<vmem>>, %arg6: memref<8x32xf32, #tpu.memory_space<vmem>>, %arg7: memref<8x128xf32, #tpu.memory_space<vmem>>) attributes {dimension_semantics = [#tpu.dimension_semantics<parallel>], iteration_bounds = array<i64: 2>, scalar_prefetch = 0 : i64, scratch_operands = 1 : i64, tpu.core_type = #tpu.core_type<tc>, window_params = [{transform_indices = @transform_0, window_bounds = array<i64: 8, 32>}, {pipeline_mode = #tpu.pipeline_mode<synchronous>, transform_indices = @transform_1, window_bounds = array<i64: 128, 128>}, {pipeline_mode = #tpu.pipeline_mode<synchronous>, transform_indices = @transform_2, window_bounds = array<i64: 1, 128>}, {pipeline_mode = #tpu.pipeline_mode<synchronous>, transform_indices = @transform_3, window_bounds = array<i64: 128, 128>}, {pipeline_mode = #tpu.pipeline_mode<synchronous>, transform_indices = @transform_4, window_bounds = array<i64: 1, 128>}, {transform_indices = @transform_5, window_bounds = array<i64: 8, 32>}]} {
    %cst = arith.constant 0.000000e+00 : f32
    %0 = vector.broadcast %cst : f32 to vector<8x128xf32>
    %c0 = arith.constant 0 : index
    %c0_0 = arith.constant 0 : index
    %1 = vector.load %arg7[%c0, %c0_0] : memref<8x128xf32, #tpu.memory_space<vmem>>, vector<8x128xf32>
    tpu.vector_store %arg7[%c0, %c0_0], %0 {strides = array<i32>} : memref<8x128xf32, #tpu.memory_space<vmem>>, vector<8x128xf32>,
    %c0_1 = arith.constant 0 : index
    %c0_2 = arith.constant 0 : index
    %2 = vector.load %arg1[%c0_1, %c0_2] : memref<8x32xf32, #tpu.memory_space<vmem>>, vector<8x32xf32>
    %c0_3 = arith.constant 0 : index
    %c0_4 = arith.constant 0 : index
    %3 = vector.load %arg7[%c0_3, %c0_4] : memref<8x128xf32, #tpu.memory_space<vmem>>, vector<8x32xf32>
    tpu.vector_store %arg7[%c0_3, %c0_4], %2 {strides = array<i32>} : memref<8x128xf32, #tpu.memory_space<vmem>>, vector<8x32xf32>,
    %c0_5 = arith.constant 0 : index
    %c0_6 = arith.constant 0 : index
    %4 = vector.load %arg7[%c0_5, %c0_6] : memref<8x128xf32, #tpu.memory_space<vmem>>, vector<8x128xf32>
    %c0_7 = arith.constant 0 : index
    %c0_8 = arith.constant 0 : index
    %5 = vector.load %arg2[%c0_7, %c0_8] : memref<128x128xf32, #tpu.memory_space<vmem>>, vector<128x128xf32>
    %cst_9 = arith.constant dense<0.000000e+00> : vector<8x128xf32>
    %6 = tpu.matmul %4, %5, %cst_9 {dimension_numbers = #tpu.dot_dimension_numbers<[1], [0], [0], [1], [0, 0, 1, 1], [], []>} : vector<8x128xf32>, vector<128x128xf32>, vector<8x128xf32> -> vector<8x128xf32>
    %c0_10 = arith.constant 0 : index
    %c0_11 = arith.constant 0 : index
    %7 = vector.load %arg3[%c0_10, %c0_11] : memref<1x128xf32, #tpu.memory_space<vmem>>, vector<1x128xf32>
    %8 = vector.broadcast %7 : vector<1x128xf32> to vector<8x128xf32>
    %9 = arith.addf %6, %8 : vector<8x128xf32>
    %cst_12 = arith.constant 0.000000e+00 : f32
    %10 = vector.broadcast %cst_12 : f32 to vector<8x128xf32>
    %11 = arith.maximumf %9, %10 : vector<8x128xf32>
    %c0_13 = arith.constant 0 : index
    %c0_14 = arith.constant 0 : index
    %12 = vector.load %arg4[%c0_13, %c0_14] : memref<128x128xf32, #tpu.memory_space<vmem>>, vector<128x128xf32>
    %cst_15 = arith.constant dense<0.000000e+00> : vector<8x128xf32>
    %13 = tpu.matmul %11, %12, %cst_15 {dimension_numbers = #tpu.dot_dimension_numbers<[1], [0], [0], [1], [0, 0, 1, 1], [], []>} : vector<8x128xf32>, vector<128x128xf32>, vector<8x128xf32> -> vector<8x128xf32>
    %c0_16 = arith.constant 0 : index
    %c0_17 = arith.constant 0 : index
    %14 = vector.load %arg5[%c0_16, %c0_17] : memref<1x128xf32, #tpu.memory_space<vmem>>, vector<1x128xf32>
    %15 = vector.broadcast %14 : vector<1x128xf32> to vector<8x128xf32>
    %16 = arith.addf %13, %15 : vector<8x128xf32>
    %17 = vector.extract_strided_slice %16 {offsets = [0, 0], sizes = [8, 32], strides = [1, 1]} : vector<8x128xf32> to vector<8x32xf32>
    %c0_18 = arith.constant 0 : index
    %c0_19 = arith.constant 0 : index
    %18 = vector.load %arg1[%c0_18, %c0_19] : memref<8x32xf32, #tpu.memory_space<vmem>>, vector<8x32xf32>
    %19 = arith.addf %17, %18 : vector<8x32xf32>
    %c0_20 = arith.constant 0 : index
    %c0_21 = arith.constant 0 : index
    %20 = vector.load %arg6[%c0_20, %c0_21] : memref<8x32xf32, #tpu.memory_space<vmem>>, vector<8x32xf32>
    tpu.vector_store %arg6[%c0_20, %c0_21], %19 {strides = array<i32>} : memref<8x32xf32, #tpu.memory_space<vmem>>, vector<8x32xf32>,
    return
  }
  func.func @transform_0(%arg0: i32) -> (i32, i32) {
    %c0_i32 = arith.constant 0 : i32
    %c0_i32_0 = arith.constant 0 : i32
    return %arg0, %c0_i32 : i32, i32
  }
  func.func @transform_1(%arg0: i32) -> (i32, i32) {
    %c0_i32 = arith.constant 0 : i32
    %c0_i32_0 = arith.constant 0 : i32
    %c0_i32_1 = arith.constant 0 : i32
    return %c0_i32, %c0_i32_0 : i32, i32
  }
  func.func @transform_2(%arg0: i32) -> (i32, i32) {
    %c0_i32 = arith.constant 0 : i32
    %c0_i32_0 = arith.constant 0 : i32
    %c0_i32_1 = arith.constant 0 : i32
    return %c0_i32, %c0_i32_0 : i32, i32
  }
  func.func @transform_3(%arg0: i32) -> (i32, i32) {
    %c0_i32 = arith.constant 0 : i32
    %c0_i32_0 = arith.constant 0 : i32
    %c0_i32_1 = arith.constant 0 : i32
    return %c0_i32, %c0_i32_0 : i32, i32
  }
  func.func @transform_4(%arg0: i32) -> (i32, i32) {
    %c0_i32 = arith.constant 0 : i32
    %c0_i32_0 = arith.constant 0 : i32
    %c0_i32_1 = arith.constant 0 : i32
    return %c0_i32, %c0_i32_0 : i32, i32
  }
  func.func @transform_5(%arg0: i32) -> (i32, i32) {
    %c0_i32 = arith.constant 0 : i32
    %c0_i32_0 = arith.constant 0 : i32
    return %arg0, %c0_i32 : i32, i32
  }
}

</mosaic_0001>

<bundles_post_ra>
// kernel: tpu_custom_call.1
= control target key start
LH: loop header
LB: loop body
LE: loop exit
PB: predicated region body
PF: predicated region fallthrough
CT: control target
= control target key end

     0   :  { %10 = vsyncpa [#allocation4], 0  ;;  %s1267_s0 = inlined_call_operand.hbm [shape: f32[16,32], index: 0, kind: input, shape index: {}]   ;;  %s1268_s1 = inlined_call_operand.hbm [shape: f32[128,128], index: 1, kind: input, shape index: {}]   ;;  %s1269_s2 = inlined_call_operand.vmem [shape: f32[1,128], index: 2, kind: input, shape index: {}]   ;;  %s1270_s3 = inlined_call_operand.hbm [shape: f32[128,128], index: 3, kind: input, shape index: {}]   ;;  %s1271_s4 = inlined_call_operand.vmem [shape: f32[1,128], index: 4, kind: input, shape index: {}]   ;;  %s1272_s5 = inlined_call_operand.hbm [shape: f32[16,32], index: 5, kind: output, shape index: {}]  }
   0x1   :  { %12 = vsyncpa [#allocation4 + $0x1], 0 }
   0x2   :  { %13 = vsyncpa [#allocation7], 0 }
   0x3   :  { %14 = vsyncpa [#allocation5], 0 }
   0x4   :  { %16 = vsyncpa [#allocation5 + $0x1], 0  ;;  %s1006_s18 = smov 0   ;;  %s1008_s19 = smov 0  }
   0x5   :  { %s1010_s20 = smov 0   ;;  %s1012_s21 = smov 0  }
   0x6 LB: > { %s1027_s22 = sadd.s32 4294967295, %s965_s21   ;;  %s567_s23 = sadd.s32 4294967294, %s965_s21   ;;  %s965_s21 = sphi %s1012_s21, %s1292_s21   ;;  %s961_s20 = sphi %s1010_s20, %s1291_s20   ;;  %s957_s19 = sphi %s1008_s19, %s1290_s19   ;;  %s953_s18 = sphi %s1006_s18, %s1289_s18  }
   0x7   : > { %p42_p0 = scmp.ne.s32.totalorder %s957_s19, %s953_s18  ;;  %p1273_p1 = scmp.eq.s32.totalorder %s1027_s22, 0 }
   0x8   : > { %p156_p3 = scmp.eq.s32.totalorder %s567_s23, 1  ;;  %p568_p5 = scmp.ge.s32.totalorder %s965_s21, 1 }
   0x9   : > { %p1036_p4 = por %p1273_p1, %p42_p0  ;;  %p163_p7 = scmp.lt.s32.totalorder %s965_s21, 3 }
   0xa   : > { %p1041_p6 = por %p156_p3, %p42_p0  ;;  %s967_s27 = smov [#allocation6]  }
   0xb   : > { %s1276_s24 = scalar_select %p1036_p4, 1, 0 }
   0xc   : > { %s1277_s25 = scalar_select %p1041_p6, 1, 0 }
   0xd   : > { %p1046_p8 = pnand %p568_p5, %p163_p7  ;;  %s175_s28 = sshll.u32 %s967_s27, 4  ;;  %s1050_s28 = int_to_ptr.vmem [resolvable:$true] %s175_s28 }
   0xe   : > { %s968_s30 = smov [#allocation8]   ;;  %s809_s9 = scalar_lea.hbm %s1268_s1, 2048 }
   0xf   : > { %p749_p9 = pneg %p1046_p8  ;;  %s191_s6 = sshll.u32 %s968_s30, 4  ;;  %s1061_s6 = int_to_ptr.vmem [resolvable:$true] %s191_s6 }
  0x10   : > { %p810_p12 = scmp.ne.s32.totalorder %s1268_s1, %s809_s9  ;;  %p816_p5 = scmp.lt.u32.totalorder %s809_s9, %s1268_s1 }
  0x11   : > { %p1057_p11 = pnand %p749_p9, %p1273_p1 }
  0x13   : > { %p811_p13 = pneg %p1057_p11 }
  0x15   : > { %p812_p0 = pnand %p811_p13, %p810_p12 }
  0x17   : > { %p813_p3 = pneg %p812_p0 }
  0x19   : > { %p818_p7 = pnand %p816_p5, %p813_p3 }
  0x1b   : > { %821 = shalt.err (!%p818_p7)
}
  0x1c   : > { %s822_s14 = scalar_lea.vmem %s1050_s28, 2048  ;;  %p830_p2 = scmp.lt.s32.totalorder %s1050_s28, %s1050_s28 }
  0x1d   : > { %p823_p9 = scmp.ne.s32.totalorder %s1050_s28, %s822_s14  ;;  %p831_p12 = scmp.lt.s32.totalorder %s822_s14, %s822_s14 }
  0x1f   : > { %p825_p10 = pnand %p823_p9, %p811_p13  ;;  %p832_p0 = por %p831_p12, %p830_p2 }
  0x21   : > { %p826_p1 = pneg %p825_p10 }
  0x23   : > { %p833_p6 = pnand %p832_p0, %p826_p1 }
  0x25   : > { %836 = shalt.err (!%p833_p6)
}
  0x26   : > { %s969_s15 = smov 128   ;;  %s970_s16 = smov 8  }
  0x27   : > { %752 = dma.hbm_to_vmem [thread:$0]  (!%p1057_p11), %s1268_s1, 2048, %s1050_s28, [#allocation7], %s969_s15, %s969_s15, %s970_s16  }
  0x28   : > { %s837_s7 = scalar_lea.hbm %s1270_s3, 2048 }
  0x29   : > { %p838_p2 = scmp.ne.s32.totalorder %s1270_s3, %s837_s7  ;;  %p844_p10 = scmp.lt.u32.totalorder %s837_s7, %s1270_s3 }
  0x2b   : > { %p840_p1 = pnand %p838_p2, %p811_p13 }
  0x2d   : > { %p841_p6 = pneg %p840_p1 }
  0x2f   : > { %p846_p3 = pnand %p844_p10, %p841_p6 }
  0x31   : > { %849 = shalt.err (!%p846_p3)
}
  0x32   : > { %s850_s28 = scalar_lea.vmem %s1061_s6, 2048  ;;  %p858_p12 = scmp.lt.s32.totalorder %s1061_s6, %s1061_s6 }
  0x33   : > { %p851_p5 = scmp.ne.s32.totalorder %s1061_s6, %s850_s28  ;;  %p859_p0 = scmp.lt.s32.totalorder %s850_s28, %s850_s28 }
  0x35   : > { %p853_p7 = pnand %p851_p5, %p811_p13  ;;  %p860_p2 = por %p859_p0, %p858_p12 }
  0x37   : > { %p854_p9 = pneg %p853_p7 }
  0x39   : > { %p861_p1 = pnand %p860_p2, %p854_p9 }
  0x3b   : > { %864 = shalt.err (!%p861_p1)
}
  0x3c   : > { %755 = dma.hbm_to_vmem [thread:$0]  (!%p1057_p11), %s1270_s3, 2048, %s1061_s6, [#allocation7], %s969_s15, %s969_s15, %s970_s16  }
  0x3d   : > { %s1116_s14 = sadd.s32 1, %s965_s21   ;;  %s29_s29 = sadd.s32 1, %s961_s20 }
  0x3e   : > { %s26_s17 = ssub.s32 %s965_s21, %s1116_s14  ;;  %p36_p13 = scmp.ne.s32.totalorder %s961_s20, %s957_s19 }
  0x3f   : > { %p27_p6 = scmp.eq.s32.totalorder %s26_s17, 0  ;;  %p37_p10 = scmp.eq.s32.totalorder %s965_s21, 0 }
  0x40   : > { %p1280_p3 = scmp.eq.s32.totalorder %s1027_s22, 1  ;;  %p766_p7 = scmp.lt.s32.totalorder %s965_s21, 2 }
  0x41   : > { %s1132_s27 = scalar_select %p27_p6, %s961_s20, %s29_s29  }
  0x42   : > { %p1126_p5 = por %p1280_p3, %p36_p13  ;;  %p38_p9 = por %p37_p10, %p36_p13 }
  0x43   : > { %s208_s30 = sand.u32 1, %s961_s20   ;;  %s573_s6 = sshll.u32 %s965_s21, 7 }
  0x44   : > { %s1281_s23 = scalar_select %p1126_p5, 1, 0 }
  0x45   : > { %s572_s7 = sshll.u32 %s208_s30, 3  ;;  %s1139_s8 = scalar_lea.hbm %s1267_s0, %s573_s6 }
  0x46   : > { %s212_s9 = scalar_lea.vmem [#allocation3], %s572_s7  ;;  %p1143_p11 = pnand %p766_p7, %p38_p9 }
  0x47   : > { %s219_s10 = sshll.u32 %s212_s9, 4  ;;  %s209_s28 = scalar_lea.sflag [#allocation4], %s208_s30  ;;  %s1141_s10 = int_to_ptr.vmem [resolvable:$true] %s219_s10 }
  0x48   : > { %s865_s12 = scalar_lea.hbm %s1139_s8, 128  ;;  %p867_p0 = pneg %p1143_p11 }
  0x49   : > { %p866_p12 = scmp.ne.s32.totalorder %s1139_s8, %s865_s12  ;;  %s870_s17 = scalar_lea.hbm %s1267_s0, 256 }
  0x4a   : > { %p871_p13 = scmp.lt.u32.totalorder %s1139_s8, %s1267_s0  ;;  %p872_p6 = scmp.lt.u32.totalorder %s870_s17, %s865_s12 }
  0x4b   : > { %p868_p2 = pnand %p867_p0, %p866_p12  ;;  %p874_p3 = scmp.lt.u32.totalorder %s865_s12, %s1139_s8 }
  0x4c   : > { %p873_p10 = por %p872_p6, %p871_p13 }
  0x4d   : > { %p869_p1 = pneg %p868_p2 }
  0x4e   : > { %p875_p7 = por %p874_p3, %p873_p10 }
  0x50   : > { %p876_p9 = pnand %p875_p7, %p869_p1 }
  0x52   : > { %879 = shalt.err (!%p876_p9)
}
  0x53   : > { %s880_s30 = scalar_lea.vmem %s1141_s10, 128  ;;  %s971_s15 = smov [#allocation3]  }
  0x54   : > { %p881_p12 = scmp.ne.s32.totalorder %s1141_s10, %s880_s30  ;;  %s885_s16 = sshll.u32 %s971_s15, 4  ;;  %s886_s16 = int_to_ptr.vmem [resolvable:$false] %s885_s16 }
  0x55   : > { %s887_s9 = scalar_lea.vmem %s886_s16, 256  ;;  %p888_p4 = scmp.lt.s32.totalorder %s1141_s10, %s886_s16 }
  0x56   : > { %p883_p2 = pnand %p881_p12, %p867_p0  ;;  %p889_p13 = scmp.lt.s32.totalorder %s887_s9, %s880_s30 }
  0x58   : > { %p884_p5 = pneg %p883_p2  ;;  %p890_p6 = por %p889_p13, %p888_p4 }
  0x5a   : > { %p891_p10 = pnand %p890_p6, %p884_p5 }
  0x5c   : > { %894 = shalt.err (!%p891_p10)
}
  0x5d   : > { %759 = dma.hbm_to_vmem [thread:$0]  (!%p1143_p11), %s1139_s8, 128, %s1141_s10, %s209_s28  }
  0x5e   : > { %228 = sbr.rel (%p1046_p8) target bundleno = 585 (0x249), region = 40  ;;  %s1175_s12 = sand.u32 (!%p1046_p8), 1, %s957_s19  }
  0x5f   : > { %s575_s13 = sshll.u32 (!%p1046_p8), %s1175_s12, 3  ;;  %s231_s29 = scalar_lea.sflag (!%p1046_p8), [#allocation4], %s1175_s12 }
  0x60   : > { %s234_s17 = scalar_lea.vmem (!%p1046_p8), [#allocation3], %s575_s13  ;;  %p1283_p4 = scmp.ne.s32.totalorder (!%p1046_p8), %s1276_s24, 0 }
  0x65   : > { %940 = dma.done.wait (%p1283_p4), %s231_s29, 128  }
  0x66   : > { %942 = vsyncadd (%p1283_p4), %s231_s29, 4294967168  ;;  %p1284_p5 = scmp.eq.s32.totalorder %s1027_s22, 0 }
  0x68   : > { %944 = dma.done.wait (%p1284_p5), [#allocation7], 4096   ;;  %p1285_p8 = pmov %p1284_p5 }
  0x69   : > { %v972_v0 = vmov 0.0|0.0   ;;  %v973_v1 = vmov 0.0   ;;  %vm974_vm0 = vmmov 0   ;;  %v274_v2 = vld [vmem:[#allocation6] sm:$0xff]  ;;  %v275_v3 = vld [vmem:[#allocation6 + $0x8] sm:$0xff]  ;;  %v276_v4 = vld [vmem:[#allocation6 + $0x10] sm:$0xff] }
  0x6a   : > { %946 = vsyncadd (%p1285_p8), [#allocation7], 4294963200  ;;  %689 = vmatprep.subr.bf16.mxu0 %v972_v0  ;;  %269 = vst [vmem:[#allocation2] sm:$0xff] %v973_v1  ;;  %651 = vmatprep.mubr.msk.f32.mxu0 %vm974_vm0, %v973_v1  ;;  %v690_v5 = vpack.c.bf16 %v275_v3, %v274_v2  ;;  %v277_v6 = vld [vmem:[#allocation6 + $0x18] sm:$0xff]  ;;  %vm271_vm1 = vcmask 261120   ;;  %v278_v8 = vld [vmem:[#allocation6 + $0x20] sm:$0xff] }
  0x6b   : > { %713 = vmatprep.subr.bf16.mxu1 %v972_v0  ;;  %686 = vmatprep.mubr.msk.f32.mxu1 %vm974_vm0, %v973_v1  ;;  %v693_v7 = vpack.c.bf16 %v277_v6, %v276_v4  ;;  %v279_v9 = vld [vmem:[#allocation6 + $0x28] sm:$0xff]  ;;  %v1192_v10 = vld [vmem:[%s234_s17] sm:$0xff]  ;;  %v368_v11 = vld [vmem:[#allocation8] sm:$0xff]  ;;  %s582_s11 = sshll.u32 %s1027_s22, 7  ;;  %s268_s28 = scalar_lea.vmem [#allocation9], %s575_s13 }
  0x6c   : > { %691 = vmatpush3.bf16.msra.mxu0 %v690_v5  ;;  %272 = vst.msk [vmem:[#allocation2] sm:$0xff] %vm271_vm1, %v1192_v10  ;;  %v369_v12 = vld [vmem:[#allocation8 + $0x8] sm:$0xff]  ;;  %v370_v13 = vld [vmem:[#allocation8 + $0x10] sm:$0xff]  ;;  %v371_v14 = vld [vmem:[#allocation8 + $0x18] sm:$0xff]  ;;  %v696_v15 = vpack.c.bf16 %v279_v9, %v278_v8  ;;  %s478_s7 = sshll.u32 %s268_s28, 4  ;;  %s1222_s15 = scalar_lea.hbm %s1272_s5, %s582_s11  ;;  %s1224_s7 = int_to_ptr.vmem [resolvable:$true] %s478_s7 }
  0x6d   : > { %692 = vmatprep.subr.bf16.mxu0 %v972_v0  ;;  %v714_v16 = vpack.c.bf16 %v369_v12, %v368_v11  ;;  %v280_v17 = vld [vmem:[#allocation6 + $0x30] sm:$0xff]  ;;  %v281_v18 = vld [vmem:[#allocation6 + $0x38] sm:$0xff]  ;;  %v717_v19 = vpack.c.bf16 %v371_v14, %v370_v13  ;;  %v372_v20 = vld [vmem:[#allocation8 + $0x20] sm:$0xff]  ;;  %s465_s22 = scalar_lea.sflag [#allocation5], %s1175_s12  ;;  %s895_s16 = scalar_lea.vmem %s1224_s7, 128 }
  0x6e   : > { %v373_v21 = vld [vmem:[#allocation8 + $0x28] sm:$0xff]  ;;  %v699_v22 = vpack.c.bf16 %v281_v18, %v280_v17  ;;  %v282_v23 = vld [vmem:[#allocation6 + $0x40] sm:$0xff]  ;;  %v374_v26 = vld [vmem:[#allocation8 + $0x30] sm:$0xff]  ;;  %p896_p11 = scmp.ne.s32.totalorder %s1224_s7, %s895_s16  ;;  %p1286_p0 = scmp.ne.s32.totalorder %s1281_s23, 0 }
  0x6f   : > { %715 = vmatpush3.bf16.msra.mxu1 %v714_v16  ;;  %v283_v24 = vld [vmem:[#allocation6 + $0x48] sm:$0xff]  ;;  %v720_v25 = vpack.c.bf16 %v373_v21, %v372_v20  ;;  %v375_v27 = vld [vmem:[#allocation8 + $0x38] sm:$0xff]  ;;  %v284_v29 = vld [vmem:[#allocation6 + $0x50] sm:$0xff]  ;;  %s975_s9 = smov [#allocation9]  }
  0x70   : > { %694 = vmatpush3.bf16.msra.mxu0 %v693_v7  ;;  %716 = vmatprep.subr.bf16.mxu1 %v972_v0  ;;  %v702_v28 = vpack.c.bf16 %v283_v24, %v282_v23  ;;  %v285_v30 = vld [vmem:[#allocation6 + $0x58] sm:$0xff]  ;;  %v723_v31 = vpack.c.bf16 %v375_v27, %v374_v26  ;;  %v376_v32 = vld [vmem:[#allocation8 + $0x40] sm:$0xff]  ;;  %v377_v33 = vld [vmem:[#allocation8 + $0x48] sm:$0xff]  ;;  %p897_p1 = pnand %p896_p11, %p1286_p0  ;;  %s899_s13 = sshll.u32 %s975_s9, 4  ;;  %s900_s13 = int_to_ptr.vmem [resolvable:$false] %s899_s13 }
  0x71   : > { %695 = vmatprep.subr.bf16.mxu0 %v972_v0  ;;  %v705_v34 = vpack.c.bf16 %v285_v30, %v284_v29  ;;  %v286_v35 = vld [vmem:[#allocation6 + $0x60] sm:$0xff]  ;;  %v287_v36 = vld [vmem:[#allocation6 + $0x68] sm:$0xff]  ;;  %v726_v37 = vpack.c.bf16 %v377_v33, %v376_v32  ;;  %v378_v38 = vld [vmem:[#allocation8 + $0x50] sm:$0xff]  ;;  %s901_s29 = scalar_lea.vmem %s900_s13, 256  ;;  %p902_p7 = scmp.lt.s32.totalorder %s1224_s7, %s900_s13 }
  0x72   : > { %v379_v39 = vld [vmem:[#allocation8 + $0x58] sm:$0xff]  ;;  %v708_v40 = vpack.c.bf16 %v287_v36, %v286_v35  ;;  %v288_v41 = vld [vmem:[#allocation6 + $0x70] sm:$0xff]  ;;  %v380_v44 = vld [vmem:[#allocation8 + $0x60] sm:$0xff]  ;;  %p898_p3 = pneg %p897_p1  ;;  %p903_p9 = scmp.lt.s32.totalorder %s901_s29, %s895_s16 }
  0x73   : > { %718 = vmatpush3.bf16.msra.mxu1 %v717_v19  ;;  %v289_v42 = vld [vmem:[#allocation6 + $0x78] sm:$0xff]  ;;  %v729_v43 = vpack.c.bf16 %v379_v39, %v378_v38  ;;  %v381_v45 = vld [vmem:[#allocation8 + $0x68] sm:$0xff]  ;;  %v382_v49 = vld [vmem:[#allocation8 + $0x70] sm:$0xff] }
  0x74   : > { %697 = vmatpush3.bf16.msra.mxu0 %v696_v15  ;;  %719 = vmatprep.subr.bf16.mxu1 %v972_v0  ;;  %v711_v46 = vpack.c.bf16 %v289_v42, %v288_v41  ;;  %v732_v47 = vpack.c.bf16 %v381_v45, %v380_v44  ;;  %v273_v48 = vld [vmem:[#allocation2] sm:$0xff]  ;;  %v383_v50 = vld [vmem:[#allocation8 + $0x78] sm:$0xff]  ;;  %p904_p12 = por %p903_p9, %p902_p7 }
  0x75   : > { %698 = vmatprep.subr.bf16.mxu0 %v972_v0  ;;  %v735_v51 = vpack.c.bf16 %v383_v50, %v382_v49  ;;  %v579_v52 = vld [vmem:[%s1269_s2] ss:$0 sm:$0xff] }
  0x76   : > { %v580_v57 = vld [vmem:[%s1271_s4] ss:$0 sm:$0xff]  ;;  %p905_p2 = pnand %p904_p12, %p898_p3 }
  0x77   : > { %721 = vmatpush3.bf16.msra.mxu1 %v720_v25 }
  0x78   : > { %700 = vmatpush3.bf16.msra.mxu0 %v699_v22  ;;  %722 = vmatprep.subr.bf16.mxu1 %v972_v0 }
  0x79   : > { %701 = vmatprep.subr.bf16.mxu0 %v972_v0 }
  0x7b   : > { %724 = vmatpush3.bf16.msra.mxu1 %v723_v31 }
  0x7c   : > { %703 = vmatpush3.bf16.msra.mxu0 %v702_v28  ;;  %725 = vmatprep.subr.bf16.mxu1 %v972_v0 }
  0x7d   : > { %704 = vmatprep.subr.bf16.mxu0 %v972_v0 }
  0x7f   : > { %727 = vmatpush3.bf16.msra.mxu1 %v726_v37 }
  0x80   : > { %706 = vmatpush3.bf16.msra.mxu0 %v705_v34  ;;  %728 = vmatprep.subr.bf16.mxu1 %v972_v0 }
  0x81   : > { %707 = vmatprep.subr.bf16.mxu0 %v972_v0 }
  0x83   : > { %730 = vmatpush3.bf16.msra.mxu1 %v729_v43 }
  0x84   : > { %709 = vmatpush3.bf16.msra.mxu0 %v708_v40  ;;  %731 = vmatprep.subr.bf16.mxu1 %v972_v0 }
  0x85   : > { %710 = vmatprep.subr.bf16.mxu0 %v972_v0 }
  0x87   : > { %733 = vmatpush3.bf16.msra.mxu1 %v732_v47 }
  0x88   : > { %712 = vmatpush3.bf16.msra.mxu0 %v711_v46  ;;  %734 = vmatprep.subr.bf16.mxu1 %v972_v0 }
  0x8b   : > { %652 = vmatmul.mubr.f32.vlgmr.msra.gmra.mrb[0].mxu0 %v273_v48  ;;  %736 = vmatpush3.bf16.msra.mxu1 %v735_v51 }
 0x15e   : > { %v363_v53 = vpop.f32.mrb[0].mxu0 }
 0x15f   : > { %v364_v54 = vadd.f32 %v579_v52, %v363_v53  ;;  %v653_v55 = vpop.f32.mrb[1].mxu0 }
 0x161   : > { %v367_v56 = vmax.f32 %v364_v54, 0.0 }
 0x163   : > { %687 = vmatmul.mubr.f32.vlgmr.msra.gmra.mrb[0].mxu1 %v367_v56 }
 0x236   : > { %v457_v58 = vpop.f32.mrb[0].mxu1 }
 0x237   : > { %v458_v59 = vadd.f32 %v580_v57, %v457_v58  ;;  %v688_v60 = vpop.f32.mrb[1].mxu1 }
 0x239   : > { %v462_v61 = vadd.f32 %v458_v59, %v1192_v10 }
 0x23b   : > { %463 = vst.msk [vmem:[%s268_s28] sm:$0xff] %vm271_vm1, %v462_v61 }
 0x23c   : > { %908 = shalt.err (!%p905_p2)
}
 0x23d   : > { %s909_s12 = scalar_lea.hbm %s1222_s15, 128  ;;  %s913_s26 = scalar_lea.hbm %s1272_s5, 256 }
 0x23e   : > { %p910_p13 = scmp.ne.s32.totalorder %s1222_s15, %s909_s12  ;;  %p914_p4 = scmp.lt.u32.totalorder %s1222_s15, %s1272_s5 }
 0x23f   : > { %p915_p5 = scmp.lt.u32.totalorder %s913_s26, %s909_s12  ;;  %p917_p11 = scmp.lt.u32.totalorder %s909_s12, %s1222_s15 }
 0x240   : > { %p911_p6 = pnand %p910_p13, %p1286_p0 }
 0x241   : > { %p916_p8 = por %p915_p5, %p914_p4 }
 0x242   : > { %p912_p10 = pneg %p911_p6 }
 0x243   : > { %p918_p1 = por %p917_p11, %p916_p8 }
 0x245   : > { %p919_p3 = pnand %p918_p1, %p912_p10 }
 0x247   : > { %922 = shalt.err (!%p919_p3)
}
 0x248   : > { %747 = dma.vmem_to_hbm [thread:$0]  (%p1286_p0), %s1224_s7, 128, %s1222_s15, %s465_s22  }
 0x249 PF: > { %s490_s11 = sand.u32 1, %s953_s18   ;;  %p1287_p7 = scmp.ne.s32.totalorder %s1277_s25, 0 }
 0x24a   : > { %p1288_p9 = scmp.ge.s32.totalorder %s965_s21, 2  ;;  %s491_s28 = scalar_lea.sflag [#allocation5], %s490_s11 }
 0x24c   : > { %p761_p12 = pnand %p1288_p9, %p1287_p7 }
 0x24e   : > { %948 = dma.done.wait (!%p761_p12), %s491_s28, 128  }
 0x24f   : > { %950 = vsyncadd (!%p761_p12), %s491_s28, 4294967168  ;;  %p19_p2 = scmp.ge.s32.totalorder %s1116_s14, 4   ;;  %s1289_s18 = smov %s957_s19 }
 0x250   : > { %s1290_s19 = smov %s961_s20  ;;  %s1291_s20 = smov %s1132_s27 }
 0x251   : > { %s1292_s21 = smov %s1116_s14  ;;  %21 = sbr.rel (!%p19_p2) target bundleno = 6 (0x6), region = 93 }
 0x258   :  { %496 = vsyncpa [#allocation4], 1 }
 0x259   :  { %498 = vsyncpa [#allocation4 + $0x1], 1 }
 0x25a   :  { %499 = vsyncpa [#allocation7], 1 }
 0x25b   :  { %500 = vsyncpa [#allocation5], 1 }
 0x25c   :  { %502 = vsyncpa [#allocation5 + $0x1], 1 }

</bundles_post_ra>
